<compile_context>
chip_gen: v7x
topology: tpu7x:2x2x1
jax: 0.10.0
libtpu: 0.0.40
codegen_flags: <defaults>
</compile_context>

<pallas_src>
import functools

import jax
import jax.numpy as jnp
from jax.experimental import pallas as pl
from jax.experimental.pallas import tpu as pltpu

_MIB = 1024 * 1024


def cls_head_kernel(x_ref, w_ref, b_ref, o_ref):
    # x_ref: (TB, TC, HW) activations in their native dtype (NCHW with HW flattened)
    # w_ref: (TC, CP)     compute dtype; pre-transposed, pre-scaled by 1/HW, class-padded
    # b_ref: (1, CP)      f32; padded lanes = -1e30
    # o_ref: (TB, CP)     f32; logits accumulator across the channel-chunk axis,
    #                     softmax probabilities after the last chunk.
    k = pl.program_id(1)

    @pl.when(k == 0)
    def _init():
        o_ref[...] = jnp.zeros_like(o_ref)

    # Global average pool == f32-accumulated sum over HW. The 1/HW scale lives in w_ref so
    # the MXU absorbs it for free.
    pooled = jnp.sum(x_ref[...], axis=-1, dtype=jnp.float32)            # (TB, TC)

    # Partial linear on the MXU: narrow operands, f32 accumulation into the resident output
    # tile (the output BlockSpec ignores the channel-chunk grid axis).
    o_ref[...] += jnp.dot(pooled.astype(w_ref.dtype), w_ref[...],
                          preferred_element_type=jnp.float32)           # (TB, CP)

    @pl.when(k == pl.num_programs(1) - 1)
    def _finalize():
        # Eval-mode softmax over classes. Padded lanes carry bias -1e30, so exp() == 0 and
        # they perturb neither the real probabilities nor the denominator.
        logits = o_ref[...] + b_ref[...]
        m = jnp.max(logits, axis=-1, keepdims=True)
        e = jnp.exp(logits - m)
        denom = jnp.sum(e, axis=-1, keepdims=True)
        o_ref[...] = e * pl.reciprocal(denom, approx=True)


def _vmem_capacity_bytes():
    """Per-core VMEM capacity (128 MiB v5e/v6e, 64 MiB v7x); conservative fallback."""
    try:
        cap = getattr(pltpu.get_tpu_info(), "vmem_capacity_bytes", None)
        if cap:
            return int(cap)
    except Exception:
        pass
    return 64 * _MIB


def _pick_tiles(B, C, HW, CP, x_itemsize, w_itemsize, budget):
    """Choose (TB, TC): batch tile and channel-chunk tile.

    The footprint accounts for every live VMEM buffer: double-buffered x and weight tiles,
    the resident f32 output/accumulator tile, the bias, the f32 pooling result and (worst
    case) an f32 convert temp for sub-32-bit activations.
    """
    x_row = HW * x_itemsize + (HW * 4 if x_itemsize < 4 else 0)

    def footprint(tb, tc):
        return (2 * tb * tc * x_row              # x tile (double-buffered) + reduce temp
                + 2 * tc * CP * w_itemsize       # weight tile (worst case double-buffered)
                + 2 * CP * 4                     # bias
                + 2 * tb * CP * 4                # resident f32 logits/output tile
                + tb * tc * 4 + tb * CP * 4)     # pooled partial + elementwise temps

    # Largest batch tile at full channel extent.
    fixed = 2 * C * CP * w_itemsize + 2 * CP * 4
    per_row = 2 * C * x_row + 2 * CP * 4 + C * 4 + CP * 4
    tb_full_c = int(min(max(0, (budget - fixed) // per_row), B, 1024))

    if tb_full_c >= min(B, 8):
        tb, tc = tb_full_c, C
        if tb < B:
            tb = max(8, (tb // 8) * 8)           # layout-friendly sublane count, never grows
    else:
        # A single (C, HW) row slab is too big for an 8-row batch tile: chunk the channel
        # axis instead (reduction grid axis). Chunks must be a multiple of 8 (sublane rule)
        # and divide C exactly so no garbage-padded channels enter the reduction.
        tb = min(B, 8)
        candidates = [c for c in range(8, C, 8) if C % c == 0]
        tc = None
        for cand in sorted(candidates, reverse=True):
            if footprint(tb, cand) <= budget:
                tc = cand
                break
        if tc is None:
            if candidates:
                tc = candidates[0]               # best effort: smallest legal chunk
            else:
                # TODO(synk): C has no multiple-of-8 divisor; fall back to full C with a
                # sub-8-row batch tile (correct, just masked sublane stores).
                tc = C
                tb = max(1, tb_full_c)

    # Guarantee >= 2 batch-axis steps when the whole batch would otherwise fit one tile: the
    # batch axis is the only "parallel" axis, so this is what lets v7x's two TensorCores
    # share the work (and gives the pipeline something to prefetch). Never tiles below 8 rows.
    if B > 1:
        cap = (((B + 1) // 2 + 7) // 8) * 8
        tb = min(tb, max(cap, 8))

    return int(max(tb, 1)), int(tc)


@functools.partial(jax.jit, static_argnames=("compute_dtype", "single_buffer_weights"))
def _cls_head_forward_impl(x_nchw, fc_weight, fc_bias, *, compute_dtype,
                           single_buffer_weights):
    B, C, H, W = x_nchw.shape
    class_dim = fc_weight.shape[0]
    HW = H * W

    # Free reshape of the native NCHW layout -- no cast/transpose pass over HBM.
    x_bchw = x_nchw.reshape(B, C, HW)

    # Pre-transpose the weight, fold in the 1/HW pooling scale (in f32), pad the class dim to
    # a lane-dense multiple of 128. Padded bias lanes get -1e30 so exp() of padded logits is 0.
    CP = ((class_dim + 127) // 128) * 128
    w_t = fc_weight.astype(jnp.float32).T * (1.0 / HW)                  # (C, class_dim)
    w_pad = jnp.zeros((C, CP), compute_dtype).at[:, :class_dim].set(w_t.astype(compute_dtype))
    b_pad = jnp.full((1, CP), -1e30, jnp.float32).at[0, :class_dim].set(
        fc_bias.astype(jnp.float32))

    # Generation-aware VMEM budget.
    cap = _vmem_capacity_bytes()
    vmem_limit = int(max(min(cap - 8 * _MIB, 112 * _MIB), 32 * _MIB))
    tile_budget = vmem_limit - 4 * _MIB          # headroom for Mosaic internal scratch

    TB, TC = _pick_tiles(B, C, HW, CP, x_bchw.dtype.itemsize,
                         jnp.dtype(compute_dtype).itemsize, tile_budget)
    nb = pl.cdiv(B, TB)
    nc = pl.cdiv(C, TC)

    # Single-buffer grid-invariant operands (weight only when it is not tiled over C).
    w_mode = pl.Buffered(1) if (single_buffer_weights and nc == 1) else None
    b_mode = pl.Buffered(1) if single_buffer_weights else None

    def spec(shape, index_map, mode):
        if mode is None:
            return pl.BlockSpec(shape, index_map)
        return pl.BlockSpec(shape, index_map, pipeline_mode=mode)

    cost = pl.CostEstimate(
        flops=B * C * HW + 2 * B * C * CP + 5 * B * CP,
        transcendentals=B * CP,
        bytes_accessed=(x_bchw.size * x_bchw.dtype.itemsize
                        + w_pad.size * w_pad.dtype.itemsize
                        + b_pad.size * b_pad.dtype.itemsize + B * CP * 4),
    )

    out_padded = pl.pallas_call(
        cls_head_kernel,
        out_shape=jax.ShapeDtypeStruct((B, CP), jnp.float32),
        grid=(nb, nc),                                       # reduction (C-chunk) axis last
        in_specs=[
            pl.BlockSpec((TB, TC, HW), lambda i, k: (i, k, 0)),
            spec((TC, CP), lambda i, k: (k, 0), w_mode),
            spec((1, CP), lambda i, k: (0, 0), b_mode),
        ],
        out_specs=pl.BlockSpec((TB, CP), lambda i, k: (i, 0)),
        compiler_params=pltpu.CompilerParams(
            dimension_semantics=("parallel", "arbitrary"),
            vmem_limit_bytes=vmem_limit,
        ),
        cost_estimate=cost,
    )(x_bchw, w_pad, b_pad)

    # TODO(synk): consumers that tolerate the padded class dim could read out_padded directly
    # and skip this extra (B, CP) HBM pass.
    return out_padded[:, :class_dim]


_SINGLE_BUFFER_SUPPORTED = None


def cls_head_forward(x_nchw, fc_weight, fc_bias, *, compute_dtype=jnp.bfloat16):
    """Eval-mode forward of ClsHead.

    x_nchw: (B, C, H, W) activations (any float dtype; the kernel reads them as-is).
    fc_weight: (class_dim, C); fc_bias: (class_dim,).
    Returns (B, class_dim) float32 softmax probabilities.
    """
    global _SINGLE_BUFFER_SUPPORTED
    if _SINGLE_BUFFER_SUPPORTED is None:
        try:
            out = _cls_head_forward_impl(x_nchw, fc_weight, fc_bias,
                                         compute_dtype=compute_dtype,
                                         single_buffer_weights=True)
            _SINGLE_BUFFER_SUPPORTED = True
            return out
        except Exception:
            # Pallas build without BlockSpec(pipeline_mode=...): fall back to the default
            # double-buffered weight/bias (costs only a few KiB of VMEM for a cls head).
            _SINGLE_BUFFER_SUPPORTED = False
    return _cls_head_forward_impl(x_nchw, fc_weight, fc_bias,
                                  compute_dtype=compute_dtype,
                                  single_buffer_weights=_SINGLE_BUFFER_SUPPORTED)


def reference_forward(x_nchw, fc_weight, fc_bias):
    pooled = jnp.mean(x_nchw.astype(jnp.float32), axis=(2, 3))          # (B, C)
    logits = pooled @ fc_weight.T + fc_bias                             # (B, class_dim)
    return jax.nn.softmax(logits, axis=1)


if __name__ == "__main__":
    # Small shapes consistent with the module: B=2, in_channels=4, 16x16 spatial, class_dim=4.
    B, C, H, W = 2, 4, 16, 16
    class_dim = 4

    key = jax.random.PRNGKey(0)
    kx, kw, kb = jax.random.split(key, 3)
    x = jax.random.normal(kx, (B, C, H, W), dtype=jnp.float32)
    fc_weight = jax.random.normal(kw, (class_dim, C), dtype=jnp.float32) * 0.1
    fc_bias = jax.random.normal(kb, (class_dim,), dtype=jnp.float32) * 0.01

    ref = reference_forward(x, fc_weight, fc_bias)

    # Default fast path: f32 activations read once in their native layout, bf16 into the MXU.
    out = jax.block_until_ready(cls_head_forward(x, fc_weight, fc_bias))
    assert out.shape == (B, class_dim)
    assert jnp.allclose(jnp.sum(out, axis=1), 1.0, atol=1e-3), "softmax rows must sum to 1"
    assert jnp.allclose(out, ref, atol=1e-2, rtol=1e-2), "bf16-path mismatch vs reference"

    # Full-precision path as a tighter numerical check of the same kernel.
    out_f32 = jax.block_until_ready(
        cls_head_forward(x, fc_weight, fc_bias, compute_dtype=jnp.float32))
    assert jnp.allclose(out_f32, ref, atol=5e-3, rtol=5e-3), "f32-path mismatch vs reference"

    # bf16 activations on the wire (as from a bf16 backbone): kernel reads them directly.
    x_bf16 = x.astype(jnp.bfloat16)
    ref_bf16 = reference_forward(x_bf16.astype(jnp.float32), fc_weight, fc_bias)
    out_bf16 = jax.block_until_ready(cls_head_forward(x_bf16, fc_weight, fc_bias))
    assert jnp.allclose(out_bf16, ref_bf16, atol=1e-2, rtol=1e-2), "bf16-input mismatch"

    print("KERNEL_OK")
</pallas_src>

<mosaic_0001>
module attributes {stable_mosaic.version = 11 : i64} {
  func.func @cls_head_kernel(%arg0: i32, %arg1: i32, %arg2: memref<2x4x256xf32, #tpu.memory_space<vmem>>, %arg3: memref<4x128xbf16, #tpu.memory_space<vmem>>, %arg4: memref<1x128xf32, #tpu.memory_space<vmem>>, %arg5: memref<2x128xf32, #tpu.memory_space<vmem>>) attributes {dimension_semantics = [#tpu.dimension_semantics<parallel>, #tpu.dimension_semantics<arbitrary>], iteration_bounds = array<i64: 1, 1>, scalar_prefetch = 0 : i64, scratch_operands = 0 : i64, tpu.core_type = #tpu.core_type<tc>, window_params = [{transform_indices = @transform_0, window_bounds = array<i64: 2, 4, 256>}, {pipeline_mode = #tpu.pipeline_mode<synchronous>, transform_indices = @transform_1, window_bounds = array<i64: 4, 128>}, {pipeline_mode = #tpu.pipeline_mode<synchronous>, transform_indices = @transform_2, window_bounds = array<i64: 1, 128>}, {transform_indices = @transform_3, window_bounds = array<i64: 2, 128>}]} {
    %c0_i32 = arith.constant 0 : i32
    %0 = arith.cmpi eq, %arg1, %c0_i32 : i32
    %1 = arith.extui %0 : i1 to i32
    %c0_i32_0 = arith.constant 0 : i32
    %2 = arith.cmpi ne, %1, %c0_i32_0 : i32
    scf.if %2 {
      %cst_12 = arith.constant 0.000000e+00 : f32
      %14 = vector.broadcast %cst_12 : f32 to vector<2x128xf32>
      %c0_13 = arith.constant 0 : index
      %c0_14 = arith.constant 0 : index
      %15 = vector.load %arg5[%c0_13, %c0_14] : memref<2x128xf32, #tpu.memory_space<vmem>>, vector<2x128xf32>
      tpu.vector_store %arg5[%c0_13, %c0_14], %14 {strides = array<i32>} : memref<2x128xf32, #tpu.memory_space<vmem>>, vector<2x128xf32>,
    } else {
    }
    %c0 = arith.constant 0 : index
    %c0_1 = arith.constant 0 : index
    %c0_2 = arith.constant 0 : index
    %3 = vector.load %arg2[%c0, %c0_1, %c0_2] : memref<2x4x256xf32, #tpu.memory_space<vmem>>, vector<2x4x256xf32>
    %cst = arith.constant dense<0.000000e+00> : vector<2x4xf32>
    %4 = vector.multi_reduction <add>, %3, %cst [2] : vector<2x4x256xf32> to vector<2x4xf32>
    %c0_3 = arith.constant 0 : index
    %c0_4 = arith.constant 0 : index
    %5 = vector.load %arg5[%c0_3, %c0_4] : memref<2x128xf32, #tpu.memory_space<vmem>>, vector<2x128xf32>
    %6 = arith.truncf %4 : vector<2x4xf32> to vector<2x4xbf16>
    %c0_5 = arith.constant 0 : index
    %c0_6 = arith.constant 0 : index
    %7 = vector.load %arg3[%c0_5, %c0_6] : memref<4x128xbf16, #tpu.memory_space<vmem>>, vector<4x128xbf16>
    %cst_7 = arith.constant dense<0.000000e+00> : vector<2x128xf32>
    %8 = tpu.matmul %6, %7, %cst_7 {dimension_numbers = #tpu.dot_dimension_numbers<[1], [0], [0], [1], [0, 0, 1, 1], [], []>} : vector<2x4xbf16>, vector<4x128xbf16>, vector<2x128xf32> -> vector<2x128xf32>
    %9 = arith.addf %5, %8 : vector<2x128xf32>
    %c0_8 = arith.constant 0 : index
    %c0_9 = arith.constant 0 : index
    %10 = vector.load %arg5[%c0_8, %c0_9] : memref<2x128xf32, #tpu.memory_space<vmem>>, vector<2x128xf32>
    tpu.vector_store %arg5[%c0_8, %c0_9], %9 {strides = array<i32>} : memref<2x128xf32, #tpu.memory_space<vmem>>, vector<2x128xf32>,
    %c0_i32_10 = arith.constant 0 : i32
    %11 = arith.cmpi eq, %arg1, %c0_i32_10 : i32
    %12 = arith.extui %11 : i1 to i32
    %c0_i32_11 = arith.constant 0 : i32
    %13 = arith.cmpi ne, %12, %c0_i32_11 : i32
    scf.if %13 {
      %c0_12 = arith.constant 0 : index
      %c0_13 = arith.constant 0 : index
      %14 = vector.load %arg5[%c0_12, %c0_13] : memref<2x128xf32, #tpu.memory_space<vmem>>, vector<2x128xf32>
      %c0_14 = arith.constant 0 : index
      %c0_15 = arith.constant 0 : index
      %15 = vector.load %arg4[%c0_14, %c0_15] : memref<1x128xf32, #tpu.memory_space<vmem>>, vector<1x128xf32>
      %16 = vector.broadcast %15 : vector<1x128xf32> to vector<2x128xf32>
      %17 = arith.addf %14, %16 : vector<2x128xf32>
      %cst_16 = arith.constant dense<0xFF800000> : vector<2xf32>
      %18 = vector.multi_reduction <maximumf>, %17, %cst_16 [1] : vector<2x128xf32> to vector<2xf32>
      %19 = vector.shape_cast %18 : vector<2xf32> to vector<2x1xf32>
      %20 = vector.broadcast %19 : vector<2x1xf32> to vector<2x128xf32>
      %21 = arith.subf %17, %20 : vector<2x128xf32>
      %22 = math.exp %21 : vector<2x128xf32>
      %cst_17 = arith.constant dense<0.000000e+00> : vector<2xf32>
      %23 = vector.multi_reduction <add>, %22, %cst_17 [1] : vector<2x128xf32> to vector<2xf32>
      %24 = vector.shape_cast %23 : vector<2xf32> to vector<2x1xf32>
      %25 = tpu.reciprocal %24 {approx = true} : vector<2x1xf32> -> vector<2x1xf32>
      %26 = vector.broadcast %25 : vector<2x1xf32> to vector<2x128xf32>
      %27 = arith.mulf %22, %26 : vector<2x128xf32>
      %c0_18 = arith.constant 0 : index
      %c0_19 = arith.constant 0 : index
      %28 = vector.load %arg5[%c0_18, %c0_19] : memref<2x128xf32, #tpu.memory_space<vmem>>, vector<2x128xf32>
      tpu.vector_store %arg5[%c0_18, %c0_19], %27 {strides = array<i32>} : memref<2x128xf32, #tpu.memory_space<vmem>>, vector<2x128xf32>,
    } else {
    }
    return
  }
  func.func @transform_0(%arg0: i32, %arg1: i32) -> (i32, i32, i32) {
    %c0_i32 = arith.constant 0 : i32
    %c0_i32_0 = arith.constant 0 : i32
    return %arg0, %arg1, %c0_i32 : i32, i32, i32
  }
  func.func @transform_1(%arg0: i32, %arg1: i32) -> (i32, i32) {
    %c0_i32 = arith.constant 0 : i32
    %c0_i32_0 = arith.constant 0 : i32
    return %arg1, %c0_i32 : i32, i32
  }
  func.func @transform_2(%arg0: i32, %arg1: i32) -> (i32, i32) {
    %c0_i32 = arith.constant 0 : i32
    %c0_i32_0 = arith.constant 0 : i32
    %c0_i32_1 = arith.constant 0 : i32
    return %c0_i32, %c0_i32_0 : i32, i32
  }
  func.func @transform_3(%arg0: i32, %arg1: i32) -> (i32, i32) {
    %c0_i32 = arith.constant 0 : i32
    %c0_i32_0 = arith.constant 0 : i32
    return %arg0, %c0_i32 : i32, i32
  }
}

module attributes {stable_mosaic.version = 11 : i64} {
  func.func @cls_head_kernel(%arg0: i32, %arg1: i32, %arg2: memref<2x4x256xf32, #tpu.memory_space<vmem>>, %arg3: memref<4x128xbf16, #tpu.memory_space<vmem>>, %arg4: memref<1x128xf32, #tpu.memory_space<vmem>>, %arg5: memref<2x128xf32, #tpu.memory_space<vmem>>) attributes {dimension_semantics = [#tpu.dimension_semantics<parallel>, #tpu.dimension_semantics<arbitrary>], iteration_bounds = array<i64: 1, 1>, scalar_prefetch = 0 : i64, scratch_operands = 0 : i64, tpu.core_type = #tpu.core_type<tc>, window_params = [{transform_indices = @transform_0, window_bounds = array<i64: 2, 4, 256>}, {transform_indices = @transform_1, window_bounds = array<i64: 4, 128>}, {pipeline_mode = #tpu.pipeline_mode<synchronous>, transform_indices = @transform_2, window_bounds = array<i64: 1, 128>}, {transform_indices = @transform_3, window_bounds = array<i64: 2, 128>}]} {
    %c0_i32 = arith.constant 0 : i32
    %0 = arith.cmpi eq, %arg1, %c0_i32 : i32
    %1 = arith.extui %0 : i1 to i32
    %c0_i32_0 = arith.constant 0 : i32
    %2 = arith.cmpi ne, %1, %c0_i32_0 : i32
    scf.if %2 {
      %cst_12 = arith.constant 0.000000e+00 : f32
      %14 = vector.broadcast %cst_12 : f32 to vector<2x128xf32>
      %c0_13 = arith.constant 0 : index
      %c0_14 = arith.constant 0 : index
      %15 = vector.load %arg5[%c0_13, %c0_14] : memref<2x128xf32, #tpu.memory_space<vmem>>, vector<2x128xf32>
      tpu.vector_store %arg5[%c0_13, %c0_14], %14 {strides = array<i32>} : memref<2x128xf32, #tpu.memory_space<vmem>>, vector<2x128xf32>,
    } else {
    }
    %c0 = arith.constant 0 : index
    %c0_1 = arith.constant 0 : index
    %c0_2 = arith.constant 0 : index
    %3 = vector.load %arg2[%c0, %c0_1, %c0_2] : memref<2x4x256xf32, #tpu.memory_space<vmem>>, vector<2x4x256xf32>
    %cst = arith.constant dense<0.000000e+00> : vector<2x4xf32>
    %4 = vector.multi_reduction <add>, %3, %cst [2] : vector<2x4x256xf32> to vector<2x4xf32>
    %c0_3 = arith.constant 0 : index
    %c0_4 = arith.constant 0 : index
    %5 = vector.load %arg5[%c0_3, %c0_4] : memref<2x128xf32, #tpu.memory_space<vmem>>, vector<2x128xf32>
    %6 = arith.truncf %4 : vector<2x4xf32> to vector<2x4xbf16>
    %c0_5 = arith.constant 0 : index
    %c0_6 = arith.constant 0 : index
    %7 = vector.load %arg3[%c0_5, %c0_6] : memref<4x128xbf16, #tpu.memory_space<vmem>>, vector<4x128xbf16>
    %cst_7 = arith.constant dense<0.000000e+00> : vector<2x128xf32>
    %8 = tpu.matmul %6, %7, %cst_7 {dimension_numbers = #tpu.dot_dimension_numbers<[1], [0], [0], [1], [0, 0, 1, 1], [], []>} : vector<2x4xbf16>, vector<4x128xbf16>, vector<2x128xf32> -> vector<2x128xf32>
    %9 = arith.addf %5, %8 : vector<2x128xf32>
    %c0_8 = arith.constant 0 : index
    %c0_9 = arith.constant 0 : index
    %10 = vector.load %arg5[%c0_8, %c0_9] : memref<2x128xf32, #tpu.memory_space<vmem>>, vector<2x128xf32>
    tpu.vector_store %arg5[%c0_8, %c0_9], %9 {strides = array<i32>} : memref<2x128xf32, #tpu.memory_space<vmem>>, vector<2x128xf32>,
    %c0_i32_10 = arith.constant 0 : i32
    %11 = arith.cmpi eq, %arg1, %c0_i32_10 : i32
    %12 = arith.extui %11 : i1 to i32
    %c0_i32_11 = arith.constant 0 : i32
    %13 = arith.cmpi ne, %12, %c0_i32_11 : i32
    scf.if %13 {
      %c0_12 = arith.constant 0 : index
      %c0_13 = arith.constant 0 : index
      %14 = vector.load %arg5[%c0_12, %c0_13] : memref<2x128xf32, #tpu.memory_space<vmem>>, vector<2x128xf32>
      %c0_14 = arith.constant 0 : index
      %c0_15 = arith.constant 0 : index
      %15 = vector.load %arg4[%c0_14, %c0_15] : memref<1x128xf32, #tpu.memory_space<vmem>>, vector<1x128xf32>
      %16 = vector.broadcast %15 : vector<1x128xf32> to vector<2x128xf32>
      %17 = arith.addf %14, %16 : vector<2x128xf32>
      %cst_16 = arith.constant dense<0xFF800000> : vector<2xf32>
      %18 = vector.multi_reduction <maximumf>, %17, %cst_16 [1] : vector<2x128xf32> to vector<2xf32>
      %19 = vector.shape_cast %18 : vector<2xf32> to vector<2x1xf32>
      %20 = vector.broadcast %19 : vector<2x1xf32> to vector<2x128xf32>
      %21 = arith.subf %17, %20 : vector<2x128xf32>
      %22 = math.exp %21 : vector<2x128xf32>
      %cst_17 = arith.constant dense<0.000000e+00> : vector<2xf32>
      %23 = vector.multi_reduction <add>, %22, %cst_17 [1] : vector<2x128xf32> to vector<2xf32>
      %24 = vector.shape_cast %23 : vector<2xf32> to vector<2x1xf32>
      %25 = tpu.reciprocal %24 {approx = true} : vector<2x1xf32> -> vector<2x1xf32>
      %26 = vector.broadcast %25 : vector<2x1xf32> to vector<2x128xf32>
      %27 = arith.mulf %22, %26 : vector<2x128xf32>
      %c0_18 = arith.constant 0 : index
      %c0_19 = arith.constant 0 : index
      %28 = vector.load %arg5[%c0_18, %c0_19] : memref<2x128xf32, #tpu.memory_space<vmem>>, vector<2x128xf32>
      tpu.vector_store %arg5[%c0_18, %c0_19], %27 {strides = array<i32>} : memref<2x128xf32, #tpu.memory_space<vmem>>, vector<2x128xf32>,
    } else {
    }
    return
  }
  func.func @transform_0(%arg0: i32, %arg1: i32) -> (i32, i32, i32) {
    %c0_i32 = arith.constant 0 : i32
    %c0_i32_0 = arith.constant 0 : i32
    return %arg0, %arg1, %c0_i32 : i32, i32, i32
  }
  func.func @transform_1(%arg0: i32, %arg1: i32) -> (i32, i32) {
    %c0_i32 = arith.constant 0 : i32
    %c0_i32_0 = arith.constant 0 : i32
    return %arg1, %c0_i32 : i32, i32
  }
  func.func @transform_2(%arg0: i32, %arg1: i32) -> (i32, i32) {
    %c0_i32 = arith.constant 0 : i32
    %c0_i32_0 = arith.constant 0 : i32
    %c0_i32_1 = arith.constant 0 : i32
    return %c0_i32, %c0_i32_0 : i32, i32
  }
  func.func @transform_3(%arg0: i32, %arg1: i32) -> (i32, i32) {
    %c0_i32 = arith.constant 0 : i32
    %c0_i32_0 = arith.constant 0 : i32
    return %arg0, %c0_i32 : i32, i32
  }
}

</mosaic_0001>

<bundles_post_ra>
// kernel: _cls_head_forward_impl.1
= control target key start
LH: loop header
LB: loop body
LE: loop exit
PB: predicated region body
PF: predicated region fallthrough
CT: control target
= control target key end

     0   :  { %vm29_vm0 = vcmask 1043456   ;;  %s242_s0 = inlined_call_operand.vmem [shape: f32[2,4,256], index: 0, kind: input, shape index: {}]   ;;  %s243_s1 = inlined_call_operand.vmem [shape: bf16[4,128], index: 1, kind: input, shape index: {}]   ;;  %s244_s2 = inlined_call_operand.vmem [shape: f32[1,128], index: 2, kind: input, shape index: {}]   ;;  %s245_s3 = inlined_call_operand.hbm [shape: f32[2,128], index: 3, kind: output, shape index: {}]  }
   0x1   :  { %v21_v0 = vld [vmem:[%s242_s0] sm:$0xff]  ;;  %v22_v1 = vld [vmem:[%s242_s0 + $0x8] sm:$0xff] }
   0x2   :  { %8 = vsyncpa [#allocation3], 0  ;;  %v25_v2 = vcombine.high %v21_v0, %v21_v0  ;;  %v30_v3 = vsel %vm29_vm0, %v21_v0, 0.0  ;;  %v26_v4 = vcombine.high %v22_v1, %v22_v1  ;;  %v35_v6 = vsel %vm29_vm0, %v22_v1, 0.0  ;;  %v43_v10 = vld [vmem:[%s243_s1] sm:$0x3] }
   0x3   :  { %vm65_vm1 = vcmask 1041408   ;;  %v192_v11 = vmov 0.0   ;;  %vm193_vm2 = vmmov 0   ;;  %v48_v13 = vlaneseq  ;;  %v150_v33 = vld [vmem:[%s244_s2] ss:$0 sm:$0xff]  ;;  %s194_s18 = smov [#allocation2]  }
   0x4   :  { %v31_v5 = vsel %vm29_vm0, %v25_v2, 0.0  ;;  %v36_v7 = vsel %vm29_vm0, %v26_v4, 0.0  ;;  %20 = vst [vmem:[#allocation2] sm:$0x3] %v192_v11  ;;  %153 = vmatprep.subr.bf16.mxu0 %v192_v11  ;;  %v67_v12 = vsel %vm65_vm1, %v43_v10, 0  ;;  %155 = vmatprep.mubr.msk.bf16.mxu0 %vm193_vm2, %v192_v11  ;;  %vm58_vm3 = vcmask 1041409  }
   0x5   :  { %v32_v8 = vadd.f32 %v31_v5, %v30_v3  ;;  %v37_v9 = vadd.f32 %v36_v7, %v35_v6  ;;  %154 = vmatpush3.bf16.msra.mxu0 %v67_v12  ;;  %v49_v15 = vand.u32 127, %v48_v13  ;;  %v51_v16 = vshrl.u32 %v48_v13, 7  ;;  %s141_s19 = sshll.u32 %s194_s18, 4  ;;  %s142_s19 = int_to_ptr.vmem [resolvable:$true] %s141_s19 }
   0x6   :  { %vm61_vm4 = vcmask 31744   ;;  %s168_s2 = scalar_lea.vmem %s142_s19, 32  ;;  %p173_p1 = scmp.lt.s32.totalorder %s142_s19, %s142_s19 }
   0x7   :  { %33 = vadd.xlane.f32.xlu0 %v32_v8  ;;  %v52_v19 = vsub.s32 %v49_v15, %v51_v16  ;;  %p169_p0 = scmp.ne.s32.totalorder %s142_s19, %s168_s2  ;;  %p174_p2 = scmp.lt.s32.totalorder %s168_s2, %s168_s2 }
   0x9   :  { %p175_p3 = por %p174_p2, %p173_p1 }
   0xb   :  { %38 = vadd.xlane.f32.xlu0 %v37_v9  ;;  %v40_v27 = vld [vmem:[#allocation2] sm:$0x3]  ;;  %p176_p4 = pnand %p175_p3, %p169_p0 }
  0x94   :  { %v34_v14 = vpop.xlane.xlu0 %33 }
  0x95   :  { %v41_v17 = vpack.c.bf16 %v34_v14, %v34_v14 }
  0x97   :  { %v46_v20 = vunpack.c.l.b16 %v41_v17 }
  0x98   :  { %v39_v18 = vpop.xlane.xlu0 %38 }
  0x99   :  { %v42_v21 = vpack.c.bf16 %v39_v18, %v39_v18  ;;  %v53_v23 = vrot.slane %v46_v20, %v52_v19 }
  0x9b   :  { %v47_v22 = vunpack.c.l.b16 %v42_v21 }
  0x9d   :  { %v57_v24 = vrot.slane %v47_v22, %v52_v19 }
  0x9f   :  { %v59_v25 = vsel %vm58_vm3, %v57_v24, %v53_v23 }
  0xa0   :  { %v60_v26 = vpack.c.b16 %v59_v25, %v59_v25 }
  0xa2   :  { %156 = vmatmul.mubr.msk.bf16.vlgmr.msra.gmra.mrb[0].mxu0 %vm61_vm4, %v60_v26 }
 0x175   :  { %v103_v28 = vpop.f32.mrb[0].mxu0 }
 0x176   :  { %v109_v29 = vadd.f32 %v103_v28, %v40_v27  ;;  %v157_v30 = vpop.f32.mrb[1].mxu0 }
 0x177   :  { %v106_v31 = vpop.f32.mrb[2].mxu0 }
 0x178   :  { %110 = vst [vmem:[#allocation2] sm:$0x3] %v109_v29  ;;  %v158_v32 = vpop.f32.mrb[3].mxu0 }
 0x17f   :  { %v114_v34 = vld [vmem:[#allocation2] sm:$0x3] }
 0x180   :  { %v122_v35 = vadd.f32 %v150_v33, %v114_v34 }
 0x182   :  { %v123_v36 = vsel %vm65_vm1, %v122_v35, -inf }
 0x183   :  { %124 = vmax.xlane.f32.xlu1 %v123_v36 }
 0x210   :  { %v125_v37 = vpop.xlane.xlu1 %124 }
 0x211   :  { %v126_v38 = vsub.f32 %v122_v35, %v125_v37 }
 0x213   :  { %v127_v39 = vmul.f32 1.442695, %v126_v38 }
 0x215   :  { %164 = vpow2.f32 %v127_v39 }
 0x21f   :  { %v165_v40 = vpop.eup %164 }
 0x220   :  { %v129_v41 = vsel %vm65_vm1, %v165_v40, 0.0 }
 0x221   :  { %130 = vadd.xlane.f32.xlu1 %v129_v41 }
 0x2ae   :  { %v131_v42 = vpop.xlane.xlu1 %130 }
 0x2af   :  { %166 = vrcp.f32 %v131_v42 }
 0x2b9   :  { %v167_v43 = vpop.eup %166 }
 0x2ba   :  { %v133_v44 = vmul.f32 %v167_v43, %v165_v40 }
 0x2bc   :  { %134 = vst [vmem:[#allocation2] sm:$0x3] %v133_v44 }
 0x2bd   :  { %179 = shalt.err (!%p176_p4)
}
 0x2be   :  { %s180_s22 = scalar_lea.hbm %s245_s3, 32 }
 0x2bf   :  { %p181_p5 = scmp.ne.s32.totalorder %s245_s3, %s180_s22  ;;  %p184_p6 = scmp.lt.u32.totalorder %s180_s22, %s245_s3 }
 0x2c1   :  { %p186_p7 = pnand %p184_p6, %p181_p5 }
 0x2c3   :  { %189 = shalt.err (!%p186_p7)
}
 0x2c4   :  { %144 = dma.vmem_to_hbm [thread:$0]  %s142_s19, 32, %s245_s3, [#allocation3]  }
 0x2c5   :  { %190 = dma.done.wait [#allocation3], 32  }
 0x2c6   :  { %191 = vsyncadd [#allocation3], 4294967264 }
 0x2c7   :  { %148 = vsyncpa [#allocation3], 1 }

// kernel: _cls_head_forward_impl.1
= control target key start
LH: loop header
LB: loop body
LE: loop exit
PB: predicated region body
PF: predicated region fallthrough
CT: control target
= control target key end

     0   :  { %vm29_vm0 = vcmask 1043456   ;;  %s242_s0 = inlined_call_operand.vmem [shape: f32[2,4,256], index: 0, kind: input, shape index: {}]   ;;  %s243_s1 = inlined_call_operand.vmem [shape: bf16[4,128], index: 1, kind: input, shape index: {}]   ;;  %s244_s2 = inlined_call_operand.vmem [shape: f32[1,128], index: 2, kind: input, shape index: {}]   ;;  %s245_s3 = inlined_call_operand.hbm [shape: f32[2,128], index: 3, kind: output, shape index: {}]  }
   0x1   :  { %v21_v0 = vld [vmem:[%s242_s0] sm:$0xff]  ;;  %v22_v1 = vld [vmem:[%s242_s0 + $0x8] sm:$0xff] }
   0x2   :  { %8 = vsyncpa [#allocation3], 0  ;;  %v25_v2 = vcombine.high %v21_v0, %v21_v0  ;;  %v30_v3 = vsel %vm29_vm0, %v21_v0, 0.0  ;;  %v26_v4 = vcombine.high %v22_v1, %v22_v1  ;;  %v35_v6 = vsel %vm29_vm0, %v22_v1, 0.0  ;;  %v43_v10 = vld [vmem:[%s243_s1] sm:$0x3] }
   0x3   :  { %vm65_vm1 = vcmask 1041408   ;;  %v192_v11 = vmov 0.0   ;;  %vm193_vm2 = vmmov 0   ;;  %v48_v13 = vlaneseq  ;;  %v150_v33 = vld [vmem:[%s244_s2] ss:$0 sm:$0xff]  ;;  %s194_s18 = smov [#allocation2]  }
   0x4   :  { %v31_v5 = vsel %vm29_vm0, %v25_v2, 0.0  ;;  %v36_v7 = vsel %vm29_vm0, %v26_v4, 0.0  ;;  %20 = vst [vmem:[#allocation2] sm:$0x3] %v192_v11  ;;  %153 = vmatprep.subr.bf16.mxu0 %v192_v11  ;;  %v67_v12 = vsel %vm65_vm1, %v43_v10, 0  ;;  %155 = vmatprep.mubr.msk.bf16.mxu0 %vm193_vm2, %v192_v11  ;;  %vm58_vm3 = vcmask 1041409  }
   0x5   :  { %v32_v8 = vadd.f32 %v31_v5, %v30_v3  ;;  %v37_v9 = vadd.f32 %v36_v7, %v35_v6  ;;  %154 = vmatpush3.bf16.msra.mxu0 %v67_v12  ;;  %v49_v15 = vand.u32 127, %v48_v13  ;;  %v51_v16 = vshrl.u32 %v48_v13, 7  ;;  %s141_s19 = sshll.u32 %s194_s18, 4  ;;  %s142_s19 = int_to_ptr.vmem [resolvable:$true] %s141_s19 }
   0x6   :  { %vm61_vm4 = vcmask 31744   ;;  %s168_s2 = scalar_lea.vmem %s142_s19, 32  ;;  %p173_p1 = scmp.lt.s32.totalorder %s142_s19, %s142_s19 }
   0x7   :  { %33 = vadd.xlane.f32.xlu0 %v32_v8  ;;  %v52_v19 = vsub.s32 %v49_v15, %v51_v16  ;;  %p169_p0 = scmp.ne.s32.totalorder %s142_s19, %s168_s2  ;;  %p174_p2 = scmp.lt.s32.totalorder %s168_s2, %s168_s2 }
   0x9   :  { %p175_p3 = por %p174_p2, %p173_p1 }
   0xb   :  { %38 = vadd.xlane.f32.xlu0 %v37_v9  ;;  %v40_v27 = vld [vmem:[#allocation2] sm:$0x3]  ;;  %p176_p4 = pnand %p175_p3, %p169_p0 }
  0x94   :  { %v34_v14 = vpop.xlane.xlu0 %33 }
  0x95   :  { %v41_v17 = vpack.c.bf16 %v34_v14, %v34_v14 }
  0x97   :  { %v46_v20 = vunpack.c.l.b16 %v41_v17 }
  0x98   :  { %v39_v18 = vpop.xlane.xlu0 %38 }
  0x99   :  { %v42_v21 = vpack.c.bf16 %v39_v18, %v39_v18  ;;  %v53_v23 = vrot.slane %v46_v20, %v52_v19 }
  0x9b   :  { %v47_v22 = vunpack.c.l.b16 %v42_v21 }
  0x9d   :  { %v57_v24 = vrot.slane %v47_v22, %v52_v19 }
  0x9f   :  { %v59_v25 = vsel %vm58_vm3, %v57_v24, %v53_v23 }
  0xa0   :  { %v60_v26 = vpack.c.b16 %v59_v25, %v59_v25 }
  0xa2   :  { %156 = vmatmul.mubr.msk.bf16.vlgmr.msra.gmra.mrb[0].mxu0 %vm61_vm4, %v60_v26 }
 0x175   :  { %v103_v28 = vpop.f32.mrb[0].mxu0 }
 0x176   :  { %v109_v29 = vadd.f32 %v103_v28, %v40_v27  ;;  %v157_v30 = vpop.f32.mrb[1].mxu0 }
 0x177   :  { %v106_v31 = vpop.f32.mrb[2].mxu0 }
 0x178   :  { %110 = vst [vmem:[#allocation2] sm:$0x3] %v109_v29  ;;  %v158_v32 = vpop.f32.mrb[3].mxu0 }
 0x17f   :  { %v114_v34 = vld [vmem:[#allocation2] sm:$0x3] }
 0x180   :  { %v122_v35 = vadd.f32 %v150_v33, %v114_v34 }
 0x182   :  { %v123_v36 = vsel %vm65_vm1, %v122_v35, -inf }
 0x183   :  { %124 = vmax.xlane.f32.xlu1 %v123_v36 }
 0x210   :  { %v125_v37 = vpop.xlane.xlu1 %124 }
 0x211   :  { %v126_v38 = vsub.f32 %v122_v35, %v125_v37 }
 0x213   :  { %v127_v39 = vmul.f32 1.442695, %v126_v38 }
 0x215   :  { %164 = vpow2.f32 %v127_v39 }
 0x21f   :  { %v165_v40 = vpop.eup %164 }
 0x220   :  { %v129_v41 = vsel %vm65_vm1, %v165_v40, 0.0 }
 0x221   :  { %130 = vadd.xlane.f32.xlu1 %v129_v41 }
 0x2ae   :  { %v131_v42 = vpop.xlane.xlu1 %130 }
 0x2af   :  { %166 = vrcp.f32 %v131_v42 }
 0x2b9   :  { %v167_v43 = vpop.eup %166 }
 0x2ba   :  { %v133_v44 = vmul.f32 %v167_v43, %v165_v40 }
 0x2bc   :  { %134 = vst [vmem:[#allocation2] sm:$0x3] %v133_v44 }
 0x2bd   :  { %179 = shalt.err (!%p176_p4)
}
 0x2be   :  { %s180_s22 = scalar_lea.hbm %s245_s3, 32 }
 0x2bf   :  { %p181_p5 = scmp.ne.s32.totalorder %s245_s3, %s180_s22  ;;  %p184_p6 = scmp.lt.u32.totalorder %s180_s22, %s245_s3 }
 0x2c1   :  { %p186_p7 = pnand %p184_p6, %p181_p5 }
 0x2c3   :  { %189 = shalt.err (!%p186_p7)
}
 0x2c4   :  { %144 = dma.vmem_to_hbm [thread:$0]  %s142_s19, 32, %s245_s3, [#allocation3]  }
 0x2c5   :  { %190 = dma.done.wait [#allocation3], 32  }
 0x2c6   :  { %191 = vsyncadd [#allocation3], 4294967264 }
 0x2c7   :  { %148 = vsyncpa [#allocation3], 1 }

</bundles_post_ra>
